<compile_context>
chip_gen: v7x
topology: tpu7x:2x2x1
jax: 0.10.0
libtpu: 0.0.40
codegen_flags: <defaults>
</compile_context>

<pallas_src>
import jax
import jax.numpy as jnp
import numpy as np
from jax import lax
from jax.experimental import pallas as pl
from jax.experimental.pallas import tpu as pltpu

# Shapes implied by the module: pooled spatial is 3x3 -> conv out 7x7 (6x6
# used by the pool) -> the input image is 1x8x8.
N = 2                     # demo batch
HW = 8                    # input spatial
CIN = 1
COUT = 10                 # conv output channels
K = 2                     # conv kernel
PH = PW = 3               # pooled spatial
NPOOL = PH * PW           # 9 pooled positions
NWIN = 4                  # 2x2 pool window elements
NPIX = HW * HW            # 64 flattened input pixels
NCLS = 10
LANE = 128                # lane-dense width for every on-chip tensor
CONV_COLS = NWIN * LANE   # 512: per-window conv outputs, each padded to 128 lanes

# Packed parameter slab (one HBM->VMEM DMA). All row offsets are 8-aligned.
W2_OFF = NPIX             # rows [64, 192): FC weight, lanes [0, 128)
B_OFF = W2_OFF + LANE     # row  192      : FC bias (lanes 10..127 = -1e30)
PROWS = 200               # slab rows, padded to a multiple of 8
NEG_PAD = -1e30           # finite "minus infinity" for padded logit lanes


def net_kernel(x_ref, w_ref, out_ref):
    # x_ref  : (n, 64)   flat images (row-major 8x8)
    # w_ref  : (200, 512) packed parameter slab
    # out_ref: (n, 128)  lane-dense log-softmax (real classes in lanes [0,10))
    x = x_ref[...]

    # Conv2d(1->10, k=2) with im2col folded into the weight: ONE matmul.
    # Column layout: window_elem*128 + pooled_pos*10 + out_channel; lanes
    # 90..127 of each 128-lane chunk are zero weight columns.
    w_conv = w_ref[0:NPIX, :]                                        # (64, 512)
    conv = jnp.dot(x, w_conv, preferred_element_type=jnp.float32)    # (n, 512)
    conv = jnp.maximum(conv, 0.0)                                    # ReLU

    # MaxPool2d(2): max over the four 128-lane-aligned window chunks.
    pooled = jnp.maximum(
        jnp.maximum(conv[:, 0 * LANE:1 * LANE], conv[:, 1 * LANE:2 * LANE]),
        jnp.maximum(conv[:, 2 * LANE:3 * LANE], conv[:, 3 * LANE:4 * LANE]))  # (n, 128)

    # Linear(90, 10), padded to 128 output lanes: one matmul + bias.
    w2 = w_ref[W2_OFF:W2_OFF + LANE, 0:LANE]                         # (128, 128)
    bias = w_ref[B_OFF:B_OFF + 1, 0:LANE]                            # (1, 128)
    logits = jnp.dot(pooled, w2, preferred_element_type=jnp.float32) + bias

    # LogSoftmax(dim=1): padded lanes sit at ~-1e30 -> exp() underflows to
    # exactly 0, so the 128-lane reduction equals the 10-class one.
    mx = jnp.max(logits, axis=1, keepdims=True)
    z = logits - mx
    lse = jnp.log(jnp.sum(jnp.exp(z), axis=1, keepdims=True))
    out_ref[...] = z - lse


def pack_params(conv_w, fc_w, fc_b):
    """Fold im2col + conv weight, FC weight and bias into one slab (one DMA)."""
    conv_w = np.asarray(conv_w, np.float32)        # (10, 1, 2, 2)
    fc_w = np.asarray(fc_w, np.float32)            # (10, 90)
    fc_b = np.asarray(fc_b, np.float32)            # (10,)
    slab = np.zeros((PROWS, CONV_COLS), np.float32)

    # Conv block, rows [0, 64): slab[pixel, w*128 + p*10 + o] accumulates
    # cw[o, 0, di, dj] for pixel = (2*pi+wi+di)*8 + (2*pj+wj+dj).
    for w_idx, (wi, wj) in enumerate(((0, 0), (0, 1), (1, 0), (1, 1))):
        for pi in range(PH):
            for pj in range(PW):
                p = pi * PW + pj
                col0 = w_idx * LANE + p * COUT
                for di in range(K):
                    for dj in range(K):
                        pix = (2 * pi + wi + di) * HW + (2 * pj + wj + dj)
                        slab[pix, col0:col0 + COUT] += conv_w[:, 0, di, dj]

    # FC weight, rows [64, 192): kernel lane p*10+o <- PyTorch flat index o*9+p.
    for o in range(COUT):
        for p in range(NPOOL):
            slab[W2_OFF + p * COUT + o, 0:NCLS] = fc_w[:, o * NPOOL + p]

    # Bias row (lane-dense padding keeps padded logits out of the softmax).
    slab[B_OFF, 0:NCLS] = fc_b
    slab[B_OFF, NCLS:LANE] = NEG_PAD
    return jnp.asarray(slab)


@jax.jit
def net_forward(x, params):
    """x: (n, 1, 8, 8) NCHW float32, params: packed slab -> (n, 10) log-probs."""
    n = x.shape[0]
    x_flat = x.reshape(n, NPIX).astype(jnp.float32)

    # TODO(synk): for large batches, add a batch grid axis (BlockSpec tile on
    # rows, dimension_semantics=("parallel",)) sized so double-buffered tiles
    # stay under v7x's 32 MiB scoped VMEM and M >= 256 (v6e/v7x) / 128 (v5e).
    out = pl.pallas_call(
        net_kernel,
        out_shape=jax.ShapeDtypeStruct((n, LANE), jnp.float32),
        in_specs=[
            pl.BlockSpec(memory_space=pltpu.MemorySpace.VMEM),
            pl.BlockSpec(memory_space=pltpu.MemorySpace.VMEM),
        ],
        out_specs=pl.BlockSpec(memory_space=pltpu.MemorySpace.VMEM),
        cost_estimate=pl.CostEstimate(
            flops=2 * (n * NPIX * CONV_COLS + n * LANE * LANE),
            transcendentals=n * LANE,
            bytes_accessed=4 * (n * NPIX + PROWS * CONV_COLS + n * LANE),
        ),
    )(x_flat, params)
    return out[:, :NCLS]


def reference(x, conv_w, fc_w, fc_b):
    """Pure-JAX reference matching PyTorch semantics exactly."""
    conv = lax.conv_general_dilated(
        x, conv_w, window_strides=(1, 1), padding="VALID",
        dimension_numbers=("NCHW", "OIHW", "NCHW"))
    r = jnp.maximum(conv, 0.0)
    pooled = lax.reduce_window(r, -jnp.inf, lax.max,
                               (1, 1, 2, 2), (1, 1, 2, 2), "VALID")
    flat = pooled.reshape(x.shape[0], COUT * NPOOL)
    logits = flat @ fc_w.T + fc_b
    return jax.nn.log_softmax(logits, axis=1)


if __name__ == "__main__":
    key = jax.random.PRNGKey(0)
    kx, kc, kw, kb = jax.random.split(key, 4)

    # Deterministic synthetic inputs / parameters (PyTorch-like uniform init).
    x = jax.random.normal(kx, (N, CIN, HW, HW), jnp.float32)
    conv_w = jax.random.uniform(kc, (COUT, CIN, K, K), jnp.float32, -0.5, 0.5)
    bound = 1.0 / np.sqrt(COUT * NPOOL)
    fc_w = jax.random.uniform(kw, (NCLS, COUT * NPOOL), jnp.float32, -bound, bound)
    fc_b = jax.random.uniform(kb, (NCLS,), jnp.float32, -bound, bound)

    params = pack_params(conv_w, fc_w, fc_b)      # one-time parameter packing
    out = jax.block_until_ready(net_forward(x, params))

    ref = jax.block_until_ready(reference(x, conv_w, fc_w, fc_b))
    assert out.shape == (N, NCLS)
    assert np.allclose(np.asarray(out), np.asarray(ref), atol=1e-4, rtol=1e-4), (
        "mismatch vs reference")

    print("KERNEL_OK")
</pallas_src>

<mosaic_0001>
module attributes {stable_mosaic.version = 11 : i64} {
  func.func @net_kernel(%arg0: memref<2x64xf32, #tpu.memory_space<vmem>>, %arg1: memref<200x512xf32, #tpu.memory_space<vmem>>, %arg2: memref<2x128xf32, #tpu.memory_space<vmem>>) attributes {dimension_semantics = [], scalar_prefetch = 0 : i64, scratch_operands = 0 : i64, tpu.core_type = #tpu.core_type<tc>} {
    %c0 = arith.constant 0 : index
    %c0_0 = arith.constant 0 : index
    %0 = vector.load %arg0[%c0, %c0_0] : memref<2x64xf32, #tpu.memory_space<vmem>>, vector<2x64xf32>
    %c0_1 = arith.constant 0 : index
    %c0_2 = arith.constant 0 : index
    %1 = vector.load %arg1[%c0_1, %c0_2] : memref<200x512xf32, #tpu.memory_space<vmem>>, vector<64x512xf32>
    %cst = arith.constant dense<0.000000e+00> : vector<2x512xf32>
    %2 = tpu.matmul %0, %1, %cst {dimension_numbers = #tpu.dot_dimension_numbers<[1], [0], [0], [1], [0, 0, 1, 1], [], []>} : vector<2x64xf32>, vector<64x512xf32>, vector<2x512xf32> -> vector<2x512xf32>
    %cst_3 = arith.constant 0.000000e+00 : f32
    %3 = vector.broadcast %cst_3 : f32 to vector<2x512xf32>
    %4 = arith.maximumf %2, %3 : vector<2x512xf32>
    %5 = vector.extract_strided_slice %4 {offsets = [0, 0], sizes = [2, 128], strides = [1, 1]} : vector<2x512xf32> to vector<2x128xf32>
    %6 = vector.extract_strided_slice %4 {offsets = [0, 128], sizes = [2, 128], strides = [1, 1]} : vector<2x512xf32> to vector<2x128xf32>
    %7 = arith.maximumf %5, %6 : vector<2x128xf32>
    %8 = vector.extract_strided_slice %4 {offsets = [0, 256], sizes = [2, 128], strides = [1, 1]} : vector<2x512xf32> to vector<2x128xf32>
    %9 = vector.extract_strided_slice %4 {offsets = [0, 384], sizes = [2, 128], strides = [1, 1]} : vector<2x512xf32> to vector<2x128xf32>
    %10 = arith.maximumf %8, %9 : vector<2x128xf32>
    %11 = arith.maximumf %7, %10 : vector<2x128xf32>
    %c64 = arith.constant 64 : index
    %c0_4 = arith.constant 0 : index
    %12 = vector.load %arg1[%c64, %c0_4] : memref<200x512xf32, #tpu.memory_space<vmem>>, vector<128x128xf32>
    %c192 = arith.constant 192 : index
    %c0_5 = arith.constant 0 : index
    %13 = vector.load %arg1[%c192, %c0_5] : memref<200x512xf32, #tpu.memory_space<vmem>>, vector<1x128xf32>
    %cst_6 = arith.constant dense<0.000000e+00> : vector<2x128xf32>
    %14 = tpu.matmul %11, %12, %cst_6 {dimension_numbers = #tpu.dot_dimension_numbers<[1], [0], [0], [1], [0, 0, 1, 1], [], []>} : vector<2x128xf32>, vector<128x128xf32>, vector<2x128xf32> -> vector<2x128xf32>
    %15 = vector.broadcast %13 : vector<1x128xf32> to vector<2x128xf32>
    %16 = arith.addf %14, %15 : vector<2x128xf32>
    %cst_7 = arith.constant dense<0xFF800000> : vector<2xf32>
    %17 = vector.multi_reduction <maximumf>, %16, %cst_7 [1] : vector<2x128xf32> to vector<2xf32>
    %18 = vector.shape_cast %17 : vector<2xf32> to vector<2x1xf32>
    %19 = vector.broadcast %18 : vector<2x1xf32> to vector<2x128xf32>
    %20 = arith.subf %16, %19 : vector<2x128xf32>
    %21 = math.exp %20 : vector<2x128xf32>
    %cst_8 = arith.constant dense<0.000000e+00> : vector<2xf32>
    %22 = vector.multi_reduction <add>, %21, %cst_8 [1] : vector<2x128xf32> to vector<2xf32>
    %23 = vector.shape_cast %22 : vector<2xf32> to vector<2x1xf32>
    %24 = math.log %23 : vector<2x1xf32>
    %25 = vector.broadcast %24 : vector<2x1xf32> to vector<2x128xf32>
    %26 = arith.subf %20, %25 : vector<2x128xf32>
    %c0_9 = arith.constant 0 : index
    %c0_10 = arith.constant 0 : index
    %27 = vector.load %arg2[%c0_9, %c0_10] : memref<2x128xf32, #tpu.memory_space<vmem>>, vector<2x128xf32>
    tpu.vector_store %arg2[%c0_9, %c0_10], %26 {strides = array<i32>} : memref<2x128xf32, #tpu.memory_space<vmem>>, vector<2x128xf32>,
    return
  }
}

</mosaic_0001>

<bundles_post_ra>
// kernel: net_forward.1
= control target key start
LH: loop header
LB: loop body
LE: loop exit
PB: predicated region body
PF: predicated region fallthrough
CT: control target
= control target key end

     0   :  { %7 = vsyncpa [#allocation3], 0  ;;  %s559_s0 = inlined_call_operand.vmem [shape: f32[2,64], index: 0, kind: input, shape index: {}]   ;;  %s560_s1 = inlined_call_operand.hbm [shape: f32[200,512], index: 1, kind: input, shape index: {}]   ;;  %s561_s2 = inlined_call_operand.hbm [shape: f32[2,128], index: 2, kind: output, shape index: {}]  }
   0x1   :  { %8 = vsyncpa [#allocation4], 0  ;;  %s497_s9 = smov [#allocation2]   ;;  %s449_s13 = scalar_lea.hbm %s560_s1, 12800 }
   0x2   :  { %s16_s10 = sshll.u32 %s497_s9, 4  ;;  %p450_p0 = scmp.ne.s32.totalorder %s560_s1, %s449_s13  ;;  %s17_s10 = int_to_ptr.vmem [resolvable:$true] %s16_s10 }
   0x3   :  { %p453_p1 = scmp.lt.u32.totalorder %s449_s13, %s560_s1 }
   0x5   :  { %p455_p2 = pnand %p453_p1, %p450_p0 }
   0x7   :  { %458 = shalt.err (!%p455_p2)
}
   0x8   :  { %s459_s18 = scalar_lea.vmem %s17_s10, 12800  ;;  %p464_p4 = scmp.lt.s32.totalorder %s17_s10, %s17_s10 }
   0x9   :  { %p460_p3 = scmp.ne.s32.totalorder %s17_s10, %s459_s18  ;;  %p465_p5 = scmp.lt.s32.totalorder %s459_s18, %s459_s18 }
   0xb   :  { %p466_p6 = por %p465_p5, %p464_p4 }
   0xd   :  { %p467_p7 = pnand %p466_p6, %p460_p3 }
   0xf   :  { %470 = shalt.err (!%p467_p7)
}
  0x10   :  { %s498_s19 = smov 512   ;;  %s499_s20 = smov 32  }
  0x11   :  { %22 = dma.hbm_to_vmem [thread:$0]  %s560_s1, 12800, %s17_s10, [#allocation3], %s498_s19, %s498_s19, %s499_s20  }
  0x12   :  { %493 = dma.done.wait [#allocation3], 12800  }
  0x13   :  { %494 = vsyncadd [#allocation3], 4294954496  ;;  %v500_v0 = vmov 0.0   ;;  %v501_v1 = vmov 0.0|0.0   ;;  %v28_v2 = vld [vmem:[#allocation2 + $0x8] sm:$0xff]  ;;  %v27_v4 = vld [vmem:[#allocation2] sm:$0xff] }
  0x14   :  { %127 = vmatprep.mubr.f32.mxu1 %v500_v0  ;;  %414 = vmatprep.subr.bf16.mxu0 %v501_v1  ;;  %v32_v3 = vld [vmem:[#allocation2 + $0x28] sm:$0xff]  ;;  %v31_v6 = vld [vmem:[#allocation2 + $0x20] sm:$0xff]  ;;  %v30_v25 = vld [vmem:[#allocation2 + $0x18] sm:$0xff]  ;;  %vm59_vm0 = vcmask 523264   ;;  %vm502_vm1 = vmmov 0   ;;  %vm299_vm2 = vcmask 1041408  }
  0x15   :  { %v382_v5 = vpack.c.bf16 %v32_v3, %v28_v2  ;;  %v36_v7 = vld [vmem:[#allocation2 + $0x48] sm:$0xff]  ;;  %v384_v9 = vpack.c.bf16 %v31_v6, %v27_v4  ;;  %v35_v11 = vld [vmem:[#allocation2 + $0x40] sm:$0xff]  ;;  %v34_v26 = vld [vmem:[#allocation2 + $0x38] sm:$0xff]  ;;  %379 = vmatprep.mubr.msk.f32.mxu0 %vm502_vm1, %v500_v0 }
  0x16   :  { %v40_v8 = vld [vmem:[#allocation2 + $0x68] sm:$0xff]  ;;  %v39_v12 = vld [vmem:[#allocation2 + $0x60] sm:$0xff]  ;;  %v398_v33 = vpack.c.bf16 %v34_v26, %v30_v25  ;;  %v29_v34 = vld [vmem:[#allocation2 + $0x10] sm:$0xff] }
  0x17   :  { %v386_v10 = vpack.c.bf16 %v40_v8, %v36_v7  ;;  %v44_v13 = vld [vmem:[#allocation2 + $0x88] sm:$0xff]  ;;  %383 = vmatprep.subr.bf16.mxu1 %v382_v5  ;;  %v388_v15 = vpack.c.bf16 %v39_v12, %v35_v11  ;;  %v43_v17 = vld [vmem:[#allocation2 + $0x80] sm:$0xff]  ;;  %v33_v35 = vld [vmem:[#allocation2 + $0x30] sm:$0xff] }
  0x18   :  { %v48_v14 = vld [vmem:[#allocation2 + $0xa8] sm:$0xff]  ;;  %385 = vmatpush1.bf16.msra.mxu1 %v384_v9  ;;  %v47_v18 = vld [vmem:[#allocation2 + $0xa0] sm:$0xff]  ;;  %v38_v36 = vld [vmem:[#allocation2 + $0x58] sm:$0xff]  ;;  %v400_v40 = vpack.c.bf16 %v33_v35, %v29_v34 }
  0x19   :  { %387 = vmatprep.subr.bf16.mxu1 %v386_v10  ;;  %v390_v16 = vpack.c.bf16 %v48_v14, %v44_v13  ;;  %v52_v19 = vld [vmem:[#allocation2 + $0xc8] sm:$0xff]  ;;  %v392_v21 = vpack.c.bf16 %v47_v18, %v43_v17  ;;  %v51_v23 = vld [vmem:[#allocation2 + $0xc0] sm:$0xff]  ;;  %v42_v37 = vld [vmem:[#allocation2 + $0x78] sm:$0xff] }
  0x1a   :  { %v56_v20 = vld [vmem:[#allocation2 + $0xe8] sm:$0xff]  ;;  %v55_v24 = vld [vmem:[#allocation2 + $0xe0] sm:$0xff]  ;;  %v402_v41 = vpack.c.bf16 %v42_v37, %v38_v36  ;;  %v37_v42 = vld [vmem:[#allocation2 + $0x50] sm:$0xff] }
  0x1b   :  { %v394_v22 = vpack.c.bf16 %v56_v20, %v52_v19  ;;  %v212_v27 = vld [vmem:[#allocation2 + $0x100] sm:$0xff]  ;;  %v396_v30 = vpack.c.bf16 %v55_v24, %v51_v23  ;;  %v41_v43 = vld [vmem:[#allocation2 + $0x70] sm:$0xff]  ;;  %v46_v44 = vld [vmem:[#allocation2 + $0x98] sm:$0xff] }
  0x1c   :  { %389 = vmatpush1.bf16.msra.mxu1 %v388_v15  ;;  %v213_v28 = vld [vmem:[#allocation2 + $0x120] sm:$0xff]  ;;  %v50_v45 = vld [vmem:[#allocation2 + $0xb8] sm:$0xff]  ;;  %v404_v46 = vpack.c.bf16 %v41_v43, %v37_v42  ;;  %v45_v48 = vld [vmem:[#allocation2 + $0x90] sm:$0xff] }
  0x1d   :  { %391 = vmatprep.subr.bf16.mxu1 %v390_v16  ;;  %v214_v29 = vld [vmem:[#allocation2 + $0x140] sm:$0xff]  ;;  %v415_v31 = vpack.c.bf16 %v213_v28, %v212_v27  ;;  %v406_v47 = vpack.c.bf16 %v50_v45, %v46_v44  ;;  %v49_v49 = vld [vmem:[#allocation2 + $0xb0] sm:$0xff]  ;;  %v54_v50 = vld [vmem:[#allocation2 + $0xd8] sm:$0xff] }
  0x1e   :  { %v215_v32 = vld [vmem:[#allocation2 + $0x160] sm:$0xff]  ;;  %v58_v51 = vld [vmem:[#allocation2 + $0xf8] sm:$0xff]  ;;  %v408_v52 = vpack.c.bf16 %v49_v49, %v45_v48  ;;  %v53_v54 = vld [vmem:[#allocation2 + $0xd0] sm:$0xff] }
  0x1f   :  { %416 = vmatpush3.bf16.msra.mxu0 %v415_v31  ;;  %v418_v38 = vpack.c.bf16 %v215_v32, %v214_v29  ;;  %v26_v39 = vld [vmem:[%s559_s0] sm:$0x3]  ;;  %v410_v53 = vpack.c.bf16 %v58_v51, %v54_v50  ;;  %v57_v55 = vld [vmem:[#allocation2 + $0xf0] sm:$0xff]  ;;  %s503_s0 = smov [#allocation5]  }
  0x20   :  { %393 = vmatpush1.bf16.msra.mxu1 %v392_v21  ;;  %417 = vmatprep.subr.bf16.mxu0 %v501_v1  ;;  %v412_v56 = vpack.c.bf16 %v57_v55, %v53_v54  ;;  %v216_v57 = vld [vmem:[#allocation2 + $0x180] sm:$0xff]  ;;  %s319_s24 = sshll.u32 %s503_s0, 4  ;;  %s320_s24 = int_to_ptr.vmem [resolvable:$true] %s319_s24 }
  0x21   :  { %395 = vmatprep.subr.bf16.mxu1 %v394_v22  ;;  %v217_v58 = vld [vmem:[#allocation2 + $0x1a0] sm:$0xff]  ;;  %s471_s25 = scalar_lea.vmem %s320_s24, 32  ;;  %p476_p9 = scmp.lt.s32.totalorder %s320_s24, %s320_s24 }
  0x22   :  { %v421_v59 = vpack.c.bf16 %v217_v58, %v216_v57  ;;  %v218_v60 = vld [vmem:[#allocation2 + $0x1c0] sm:$0xff]  ;;  %p472_p8 = scmp.ne.s32.totalorder %s320_s24, %s471_s25  ;;  %p477_p10 = scmp.lt.s32.totalorder %s471_s25, %s471_s25 }
  0x23   :  { %419 = vmatpush3.bf16.msra.mxu0 %v418_v38  ;;  %v219_v61 = vld [vmem:[#allocation2 + $0x1e0] sm:$0xff] }
  0x24   :  { %397 = vmatpush1.bf16.msra.mxu1 %v396_v30  ;;  %420 = vmatprep.subr.bf16.mxu0 %v501_v1  ;;  %v424_v62 = vpack.c.bf16 %v219_v61, %v218_v60  ;;  %v220_v63 = vld [vmem:[#allocation2 + $0x200] sm:$0xff]  ;;  %p478_p11 = por %p477_p10, %p476_p9 }
  0x25   :  { %399 = vmatprep.subr.bf16.mxu1 %v398_v33  ;;  %v221_v2 = vld [vmem:[#allocation2 + $0x220] sm:$0xff] }
  0x26   :  { %v427_v3 = vpack.c.bf16 %v221_v2, %v220_v63  ;;  %v222_v4 = vld [vmem:[#allocation2 + $0x240] sm:$0xff]  ;;  %p479_p12 = pnand %p478_p11, %p472_p8 }
  0x27   :  { %328 = vmatmul.mubr.msk.f32.vlgmr.msra.gmra.mrb[0].mxu1 %vm59_vm0, %v26_v39  ;;  %422 = vmatpush3.bf16.msra.mxu0 %v421_v59  ;;  %v223_v5 = vld [vmem:[#allocation2 + $0x260] sm:$0xff] }
  0x28   :  { %401 = vmatpush1.bf16.msra.mxu1 %v400_v40  ;;  %198 = vmatprep.mubr.f32.mxu1 %v500_v0  ;;  %v430_v6 = vpack.c.bf16 %v223_v5, %v222_v4  ;;  %v224_v7 = vld [vmem:[#allocation2 + $0x280] sm:$0xff] }
  0x29   :  { %403 = vmatprep.subr.bf16.mxu1 %v402_v41  ;;  %423 = vmatprep.subr.bf16.mxu0 %v501_v1  ;;  %v225_v8 = vld [vmem:[#allocation2 + $0x2a0] sm:$0xff] }
  0x2a   :  { %v433_v9 = vpack.c.bf16 %v225_v8, %v224_v7  ;;  %v226_v10 = vld [vmem:[#allocation2 + $0x2c0] sm:$0xff] }
  0x2b   :  { %425 = vmatpush3.bf16.msra.mxu0 %v424_v62  ;;  %v227_v11 = vld [vmem:[#allocation2 + $0x2e0] sm:$0xff] }
  0x2c   :  { %405 = vmatpush1.bf16.msra.mxu1 %v404_v46  ;;  %426 = vmatprep.subr.bf16.mxu0 %v501_v1  ;;  %v436_v12 = vpack.c.bf16 %v227_v11, %v226_v10 }
  0x2d   :  { %407 = vmatprep.subr.bf16.mxu1 %v406_v47 }
  0x2f   :  { %428 = vmatpush3.bf16.msra.mxu0 %v427_v3 }
  0x30   :  { %409 = vmatpush1.bf16.msra.mxu1 %v408_v52  ;;  %429 = vmatprep.subr.bf16.mxu0 %v501_v1 }
  0x31   :  { %411 = vmatprep.subr.bf16.mxu1 %v410_v53 }
  0x33   :  { %431 = vmatpush3.bf16.msra.mxu0 %v430_v6 }
  0x34   :  { %413 = vmatpush1.bf16.msra.mxu1 %v412_v56  ;;  %432 = vmatprep.subr.bf16.mxu0 %v501_v1 }
  0x37   :  { %329 = vmatmul.mubr.msk.f32.vlgmr.msra.gmra.mrb[2].mxu1 %vm59_vm0, %v26_v39  ;;  %434 = vmatpush3.bf16.msra.mxu0 %v433_v9 }
  0x38   :  { %435 = vmatprep.subr.bf16.mxu0 %v501_v1  ;;  %v228_v1 = vld [vmem:[#allocation2 + $0x300] ss:$0 sm:$0xff] }
  0x3b   :  { %437 = vmatpush3.bf16.msra.mxu0 %v436_v12 }
  0xfa   :  { %v129_v13 = vpop.f32.mrb[0].mxu1 }
  0xfb   :  { %v205_v14 = vmax.f32 %v129_v13, 0.0  ;;  %v131_v15 = vpop.f32.mrb[1].mxu1 }
  0xfc   :  { %v206_v16 = vmax.f32 %v131_v15, 0.0 }
  0xfe   :  { %v209_v17 = vmax.f32 %v205_v14, %v206_v16 }
 0x10a   :  { %v200_v18 = vpop.f32.mrb[2].mxu1 }
 0x10b   :  { %v207_v19 = vmax.f32 %v200_v18, 0.0  ;;  %v202_v20 = vpop.f32.mrb[3].mxu1 }
 0x10c   :  { %v208_v21 = vmax.f32 %v202_v20, 0.0 }
 0x10e   :  { %v210_v22 = vmax.f32 %v207_v19, %v208_v21 }
 0x110   :  { %v211_v23 = vmax.f32 %v209_v17, %v210_v22 }
 0x112   :  { %380 = vmatmul.mubr.f32.vlgmr.msra.gmra.mrb[0].mxu0 %v211_v23 }
 0x1e5   :  { %v295_v24 = vpop.f32.mrb[0].mxu0 }
 0x1e6   :  { %v296_v25 = vadd.f32 %v295_v24, %v228_v1  ;;  %v381_v26 = vpop.f32.mrb[1].mxu0 }
 0x1e8   :  { %v300_v27 = vsel %vm299_vm2, %v296_v25, -inf }
 0x1e9   :  { %301 = vmax.xlane.f32.xlu0 %v300_v27 }
 0x276   :  { %v302_v0 = vpop.xlane.xlu0 %301 }
 0x277   :  { %v303_v28 = vsub.f32 %v296_v25, %v302_v0 }
 0x279   :  { %v304_v29 = vmul.f32 1.442695, %v303_v28 }
 0x27b   :  { %445 = vpow2.f32 %v304_v29 }
 0x285   :  { %v446_v30 = vpop.eup %445 }
 0x286   :  { %v306_v31 = vsel %vm299_vm2, %v446_v30, 0.0 }
 0x287   :  { %307 = vadd.xlane.f32.xlu0 %v306_v31 }
 0x314   :  { %v308_v32 = vpop.xlane.xlu0 %307 }
 0x315   :  { %447 = vlog2.f32 %v308_v32 }
 0x31f   :  { %v448_v33 = vpop.eup %447 }
 0x320   :  { %v310_v34 = vmul.f32 0.6931472, %v448_v33 }
 0x322   :  { %v311_v35 = vsub.f32 %v303_v28, %v310_v34 }
 0x324   :  { %312 = vst [vmem:[#allocation5] sm:$0x3] %v311_v35 }
 0x325   :  { %482 = shalt.err (!%p479_p12)
}
 0x326   :  { %s483_s28 = scalar_lea.hbm %s561_s2, 32 }
 0x327   :  { %p484_p13 = scmp.ne.s32.totalorder %s561_s2, %s483_s28  ;;  %p487_p0 = scmp.lt.u32.totalorder %s483_s28, %s561_s2 }
 0x329   :  { %p489_p1 = pnand %p487_p0, %p484_p13 }
 0x32b   :  { %492 = shalt.err (!%p489_p1)
}
 0x32c   :  { %322 = dma.vmem_to_hbm [thread:$0]  %s320_s24, 32, %s561_s2, [#allocation4]  }
 0x32d   :  { %495 = dma.done.wait [#allocation4], 32  }
 0x32e   :  { %496 = vsyncadd [#allocation4], 4294967264 }
 0x32f   :  { %326 = vsyncpa [#allocation3], 1 }
 0x330   :  { %327 = vsyncpa [#allocation4], 1 }

</bundles_post_ra>
